<compile_context>
chip_gen: v7x
topology: tpu7x:2x2x1
jax: 0.10.0
libtpu: 0.0.40
codegen_flags: <defaults>
</compile_context>

<pallas_src>
import functools

import jax
import jax.numpy as jnp
from jax.experimental import pallas as pl
from jax.experimental.pallas import tpu as pltpu

SMOOTH = 1.0
# TODO(synk): BinaryFocalLoss source was not included in the spec; the fused
# focal term uses the standard sigmoid focal-BCE (alpha=0.25, gamma=2, 'mean').
FOCAL_ALPHA = 0.25

# With the exp(-|x|) formulation: sigmoid(-1e30) == 0 and softplus(-1e30) == 0
# exactly (clean underflow, no inf intermediate), so padded / masked positions
# contribute exactly zero to every partial sum.
_NEG_PAD = -1e30


def _cdiv(a, b):
    return -(-a // b)


def _round_up(a, b):
    return _cdiv(a, b) * b


def _sublane_multiple(itemsize):
    # native sublane packing: f32 -> 8, bf16 -> 16, int8/bool -> 32
    return max(8, 32 // max(1, itemsize))


def _fused_kernel(x_ref, t_ref, num_ref, den_ref, foc_ref, *,
                  rows, tr, steps, use_sigmoid, binary_target, alpha,
                  need_row_mask):
    """Grid: (num_chunks [parallel], d_blocks [parallel], steps [arbitrary]).

    x_ref, t_ref              : (td0, tr, 128) lane-packed input blocks.
    num_ref, den_ref, foc_ref : (td0, 128) per-lane partial sums for the
        current (chunk, batch-tile), resident accumulators across `steps`.
    """
    s = pl.program_id(2)

    @pl.when(s == 0)
    def _():
        num_ref[...] = jnp.zeros_like(num_ref)
        den_ref[...] = jnp.zeros_like(den_ref)
        foc_ref[...] = jnp.zeros_like(foc_ref)

    x = x_ref[...].astype(jnp.float32)          # (td0, tr, 128)
    t = t_ref[...].astype(jnp.float32)

    if need_row_mask:
        # Static over-coverage of the row axis: mask by the *intended* global
        # row index (the index_map may have clamped the actual DMA), so both
        # partial edge blocks and fully out-of-range blocks contribute 0.
        g = pl.program_id(0)
        row0 = (g * steps + s) * tr
        ridx = row0 + jax.lax.broadcasted_iota(jnp.int32, (1, tr, 1), 1)
        valid = ridx < rows
        x = jnp.where(valid, x, _NEG_PAD if use_sigmoid else 0.0)
        t = jnp.where(valid, t, 0.0)

    t_abs = t if binary_target else jnp.abs(t)

    if use_sigmoid:
        # One exp reused for sigmoid and softplus; one divide; one log.
        e = jnp.exp(-jnp.abs(x))                # EUP; finite everywhere
        r = 1.0 / (1.0 + e)
        p = jnp.where(x >= 0.0, r, e * r)       # sigmoid(x)

        # --- BinaryDiceLoss partial sums (reduce only the sublane axis). ---
        num_ref[...] += jnp.sum(p * t, axis=1)
        den_ref[...] += jnp.sum(p + t_abs, axis=1)      # p >= 0: abs dropped

        # --- Focal-BCE partials: alpha_t * (1 - p_t)^2 * BCE_with_logits. ---
        sp = jnp.maximum(x, 0.0) + jnp.log(1.0 + e)     # stable softplus(x)
        bce = sp - x * t
        q = t + p - 2.0 * t * p                         # = 1 - p_t
        alpha_t = (1.0 - alpha) + (2.0 * alpha - 1.0) * t
        foc_ref[...] += jnp.sum(alpha_t * (q * q) * bce, axis=1)
    else:
        num_ref[...] += jnp.sum(x * t, axis=1)
        den_ref[...] += jnp.sum(jnp.abs(x) + t_abs, axis=1)
        # focal partials stay zero on the no-sigmoid path (unused by callers)


def _fused_partials(output, target, *, use_sigmoid=True, batch_dice=False,
                    binary_target=False, num_chunks=1, block_bytes=8 << 20,
                    focal_alpha=FOCAL_ALPHA, core_parallel_chunks=False):
    """One HBM pass; returns (num, den, focal) per-lane partials of shape
    (dim0, num_chunks*128)."""
    assert output.shape[0] == target.shape[0], "output & target batch size don't match"
    n = output.shape[0]
    dim0 = 1 if batch_dice else n
    out2d = jnp.reshape(output, (dim0, -1))
    tgt2d = jnp.reshape(target, (dim0, -1))     # native dtype (int8/bool mask is exact)
    f = out2d.shape[1]

    # Lane alignment: only a ragged feature count needs a minimal pad to the
    # next multiple of 128 so the (free, bitcast) reshape below is legal.
    # TODO(synk): for ragged f this is still an XLA copy unless fused; the
    # common lane-aligned case pays nothing.
    pad_cols = (-f) % 128
    if pad_cols:
        fill = _NEG_PAD if use_sigmoid else 0.0
        out2d = jnp.pad(out2d, ((0, 0), (0, pad_cols)), constant_values=fill)
        tgt2d = jnp.pad(tgt2d, ((0, 0), (0, pad_cols)), constant_values=0)
    rows = (f + pad_cols) // 128
    out3 = out2d.reshape(dim0, rows, 128)       # bitcast when pad_cols == 0
    tgt3 = tgt2d.reshape(dim0, rows, 128)

    # ---------------- tiling ----------------
    bpe = out3.dtype.itemsize + tgt3.dtype.itemsize
    sub = max(_sublane_multiple(out3.dtype.itemsize),
              _sublane_multiple(tgt3.dtype.itemsize))

    # Batch tile: full batch when a minimal block fits the budget, else a
    # multiple of 8 (guards VMEM for large batches, esp. v7x's 64 MiB).
    d0_budget = max(1, block_bytes // (sub * 128 * bpe))
    if dim0 <= max(8, d0_budget):
        td0 = dim0
    else:
        td0 = max(8, (d0_budget // 8) * 8)
    d_blocks = _cdiv(dim0, td0)

    # Row tile: multiple of `sub` (or the full row extent) within block_bytes.
    tr_cap = max(sub, (block_bytes // (td0 * 128 * bpe)) // sub * sub)
    tr = min(tr_cap, _round_up(_cdiv(rows, num_chunks), sub))
    if tr >= rows:
        tr = rows                                # full-extent block is always legal
    steps = _cdiv(rows, num_chunks * tr)
    nb = _cdiv(rows, tr)                         # valid row-blocks in the array
    need_row_mask = num_chunks * steps * tr > rows
    need_clamp = num_chunks * steps > nb         # keep every DMA in bounds

    if need_clamp:
        in_idx = lambda g, d, s: (d, jnp.minimum(g * steps + s, nb - 1), 0)
    else:
        in_idx = lambda g, d, s: (d, g * steps + s, 0)
    in_spec = pl.BlockSpec((td0, tr, 128), in_idx)
    part_shape = jax.ShapeDtypeStruct((dim0, num_chunks * 128), jnp.float32)
    part_spec = pl.BlockSpec((td0, 128), lambda g, d, s: (d, g))

    kernel = functools.partial(
        _fused_kernel, rows=rows, tr=tr, steps=steps, use_sigmoid=use_sigmoid,
        binary_target=bool(binary_target), alpha=float(focal_alpha),
        need_row_mask=need_row_mask)

    block_in_bytes = td0 * tr * 128 * bpe
    vmem_limit = int(2 * block_in_bytes + 6 * td0 * 128 * 4 + (16 << 20))

    total = dim0 * rows * 128
    cost = pl.CostEstimate(
        flops=int(20 * total),
        transcendentals=int(3 * total),
        bytes_accessed=int(total * bpe + 3 * dim0 * num_chunks * 128 * 4),
    )

    # On v7x set num_chunks=2 and core_parallel_chunks=True so the chunk axis
    # lands on both TensorCores; plain "parallel" is safe on every generation.
    chunk_sem = pltpu.CORE_PARALLEL if core_parallel_chunks else "parallel"
    compiler_params = pltpu.CompilerParams(
        dimension_semantics=(chunk_sem, "parallel", "arbitrary"),
        vmem_limit_bytes=vmem_limit,
        allow_input_fusion=[True, True] if pad_cols else None,
    )

    num_p, den_p, foc_p = pl.pallas_call(
        kernel,
        out_shape=(part_shape, part_shape, part_shape),
        grid_spec=pltpu.PrefetchScalarGridSpec(
            num_scalar_prefetch=0,
            grid=(num_chunks, d_blocks, steps),
            in_specs=[in_spec, in_spec],
            out_specs=(part_spec, part_spec, part_spec),
        ),
        compiler_params=compiler_params,
        cost_estimate=cost,
    )(out3, tgt3)
    return num_p, den_p, foc_p


def binary_dice_loss(output, target, *, use_sigmoid=True, reduction="mean",
                     ignore_index=None, batch_dice=False, smooth=SMOOTH,
                     binary_target=False, num_chunks=1, block_bytes=8 << 20):
    """JAX/Pallas equivalent of BinaryDiceLoss.forward (module defaults)."""
    assert ignore_index is None  # TODO(synk): ignore_index masking not needed for module defaults
    num_p, den_p, _ = _fused_partials(output, target, use_sigmoid=use_sigmoid,
                                      batch_dice=batch_dice, binary_target=binary_target,
                                      num_chunks=num_chunks, block_bytes=block_bytes)
    num = 2.0 * jnp.sum(num_p, axis=1) + smooth
    den = jnp.sum(den_p, axis=1) + smooth
    loss = 1.0 - num / den
    if reduction == "mean":
        return jnp.mean(loss)
    elif reduction == "sum":
        return jnp.sum(loss)
    elif reduction == "none":
        return loss
    else:
        raise Exception("Unexpected reduction {}".format(reduction))


def binary_focal_dice(logits, target, *, batch_dice=False, smooth=SMOOTH,
                      focal_alpha=FOCAL_ALPHA, binary_target=False,
                      num_chunks=1, block_bytes=8 << 20,
                      core_parallel_chunks=False):
    """JAX/Pallas equivalent of Binary_Focal_Dice.forward (one fused HBM pass)."""
    num_p, den_p, foc_p = _fused_partials(
        logits, target, use_sigmoid=True, batch_dice=batch_dice,
        binary_target=binary_target, num_chunks=num_chunks,
        block_bytes=block_bytes, focal_alpha=focal_alpha,
        core_parallel_chunks=core_parallel_chunks)
    num = 2.0 * jnp.sum(num_p, axis=1) + smooth
    den = jnp.sum(den_p, axis=1) + smooth
    dice = jnp.mean(1.0 - num / den)            # BinaryDiceLoss(reduction='mean')
    dice_loss = -jnp.log(1.0 - dice)
    focal_loss = jnp.sum(foc_p) / logits.size   # focal 'mean' over real elements
    loss = dice_loss + focal_loss
    return loss, (dice_loss, focal_loss)


# ------------------------- pure-JAX references -------------------------

def _reference_dice(output, target, smooth=SMOOTH):
    n = output.shape[0]
    x = 1.0 / (1.0 + jnp.exp(-output.astype(jnp.float32).reshape(n, -1)))
    t = target.astype(jnp.float32).reshape(n, -1)
    num = 2.0 * jnp.sum(x * t, axis=1) + smooth
    den = jnp.sum(jnp.abs(x) + jnp.abs(t), axis=1) + smooth
    return jnp.mean(1.0 - num / den)


def _reference_focal_dice(logits, target, smooth=SMOOTH, alpha=FOCAL_ALPHA):
    n = logits.shape[0]
    x = logits.astype(jnp.float32).reshape(n, -1)
    t = target.astype(jnp.float32).reshape(n, -1)
    p = 1.0 / (1.0 + jnp.exp(-x))
    num = 2.0 * jnp.sum(p * t, axis=1) + smooth
    den = jnp.sum(p + jnp.abs(t), axis=1) + smooth
    dice = jnp.mean(1.0 - num / den)
    dice_loss = -jnp.log(1.0 - dice)
    sp = jnp.maximum(x, 0.0) + jnp.log(1.0 + jnp.exp(-jnp.abs(x)))
    bce = sp - x * t
    q = t + p - 2.0 * t * p
    alpha_t = alpha * t + (1.0 - alpha) * (1.0 - t)
    focal_loss = jnp.mean(alpha_t * q * q * bce)
    return dice_loss, focal_loss


if __name__ == "__main__":
    root = jax.random.PRNGKey(0)

    def make_inputs(case, shape):
        k1, k2 = jax.random.split(jax.random.fold_in(root, case))
        logits = jax.random.normal(k1, shape, dtype=jnp.float32)
        # binary {0,1} mask as int8: 1 B/elem HBM stream, exact after f32 cast
        target = (jax.random.uniform(k2, shape) > 0.5).astype(jnp.int8)
        return logits, target

    def check(a, b, msg):
        assert jnp.allclose(a, b, atol=1e-5, rtol=1e-4), (msg, a, b)

    # --- main case: module-like shapes, lane-aligned f (no pad, no mask) ---
    logits, target = make_inputs(0, (2, 4, 16, 16))
    loss, (dice_l, focal_l) = binary_focal_dice(logits, target)
    loss = jax.block_until_ready(loss)
    ref_dice, ref_focal = _reference_focal_dice(logits, target)
    check(dice_l, ref_dice, "dice_loss")
    check(focal_l, ref_focal, "focal_loss")
    check(loss, ref_dice + ref_focal, "total loss")

    # standalone BinaryDiceLoss path (defaults) also matches
    d = jax.block_until_ready(binary_dice_loss(logits, target))
    check(d, _reference_dice(logits, target), "binary_dice_loss")

    # --- ragged feature count + chunk axis (minimal pad, row mask, index clamp) ---
    logits, target = make_inputs(1, (2, 3, 10, 10))
    loss, (dl, fl) = binary_focal_dice(logits, target, num_chunks=2)
    rd, rf = _reference_focal_dice(logits, target)
    check(jax.block_until_ready(loss), rd + rf, "ragged loss")
    check(dl, rd, "ragged dice")
    check(fl, rf, "ragged focal")

    # --- multi-step grid with a partial last block (row mask across steps) ---
    logits, target = make_inputs(2, (2, 4, 32, 80))
    loss, (dl, fl) = binary_focal_dice(logits, target, num_chunks=2,
                                       block_bytes=1 << 15)
    rd, rf = _reference_focal_dice(logits, target)
    check(jax.block_until_ready(loss), rd + rf, "masked loss")
    check(dl, rd, "masked dice")
    check(fl, rf, "masked focal")

    # --- larger batch: dim0 tiled with the extra grid axis (edge batch block) ---
    logits, target = make_inputs(3, (20, 2, 128))
    loss, (dl, fl) = binary_focal_dice(logits, target, block_bytes=1 << 15)
    rd, rf = _reference_focal_dice(logits, target)
    check(jax.block_until_ready(loss), rd + rf, "batch-tiled loss")
    check(dl, rd, "batch-tiled dice")
    check(fl, rf, "batch-tiled focal")

    print("KERNEL_OK")
</pallas_src>

<mosaic_0001>
module attributes {stable_mosaic.version = 11 : i64} {
  func.func @_fused_kernel(%arg0: i32, %arg1: i32, %arg2: i32, %arg3: memref<2x8x128xf32, #tpu.memory_space<vmem>>, %arg4: memref<2x8x128xi8, #tpu.memory_space<vmem>>, %arg5: memref<2x128xf32, #tpu.memory_space<vmem>>, %arg6: memref<2x128xf32, #tpu.memory_space<vmem>>, %arg7: memref<2x128xf32, #tpu.memory_space<vmem>>) attributes {dimension_semantics = [#tpu.dimension_semantics<parallel>, #tpu.dimension_semantics<parallel>, #tpu.dimension_semantics<arbitrary>], iteration_bounds = array<i64: 1, 1, 1>, scalar_prefetch = 0 : i64, scratch_operands = 0 : i64, tpu.core_type = #tpu.core_type<tc>, window_params = [{transform_indices = @transform_0, window_bounds = array<i64: 2, 8, 128>}, {transform_indices = @transform_1, window_bounds = array<i64: 2, 8, 128>}, {transform_indices = @transform_2, window_bounds = array<i64: 2, 128>}, {transform_indices = @transform_3, window_bounds = array<i64: 2, 128>}, {transform_indices = @transform_4, window_bounds = array<i64: 2, 128>}]} {
    %c0_i32 = arith.constant 0 : i32
    %0 = arith.cmpi eq, %arg2, %c0_i32 : i32
    %1 = arith.extui %0 : i1 to i32
    %c0_i32_0 = arith.constant 0 : i32
    %2 = arith.cmpi ne, %1, %c0_i32_0 : i32
    scf.if %2 {
      %cst_29 = arith.constant 0.000000e+00 : f32
      %53 = vector.broadcast %cst_29 : f32 to vector<2x128xf32>
      %c0_30 = arith.constant 0 : index
      %c0_31 = arith.constant 0 : index
      %54 = vector.load %arg5[%c0_30, %c0_31] : memref<2x128xf32, #tpu.memory_space<vmem>>, vector<2x128xf32>
      tpu.vector_store %arg5[%c0_30, %c0_31], %53 {strides = array<i32>} : memref<2x128xf32, #tpu.memory_space<vmem>>, vector<2x128xf32>,
      %cst_32 = arith.constant 0.000000e+00 : f32
      %55 = vector.broadcast %cst_32 : f32 to vector<2x128xf32>
      %c0_33 = arith.constant 0 : index
      %c0_34 = arith.constant 0 : index
      %56 = vector.load %arg6[%c0_33, %c0_34] : memref<2x128xf32, #tpu.memory_space<vmem>>, vector<2x128xf32>
      tpu.vector_store %arg6[%c0_33, %c0_34], %55 {strides = array<i32>} : memref<2x128xf32, #tpu.memory_space<vmem>>, vector<2x128xf32>,
      %cst_35 = arith.constant 0.000000e+00 : f32
      %57 = vector.broadcast %cst_35 : f32 to vector<2x128xf32>
      %c0_36 = arith.constant 0 : index
      %c0_37 = arith.constant 0 : index
      %58 = vector.load %arg7[%c0_36, %c0_37] : memref<2x128xf32, #tpu.memory_space<vmem>>, vector<2x128xf32>
      tpu.vector_store %arg7[%c0_36, %c0_37], %57 {strides = array<i32>} : memref<2x128xf32, #tpu.memory_space<vmem>>, vector<2x128xf32>,
    } else {
    }
    %c0 = arith.constant 0 : index
    %c0_1 = arith.constant 0 : index
    %c0_2 = arith.constant 0 : index
    %3 = vector.load %arg3[%c0, %c0_1, %c0_2] : memref<2x8x128xf32, #tpu.memory_space<vmem>>, vector<2x8x128xf32>
    %c0_3 = arith.constant 0 : index
    %c0_4 = arith.constant 0 : index
    %c0_5 = arith.constant 0 : index
    %4 = vector.load %arg4[%c0_3, %c0_4, %c0_5] : memref<2x8x128xi8, #tpu.memory_space<vmem>>, vector<2x8x128xi8>
    %5 = arith.sitofp %4 : vector<2x8x128xi8> to vector<2x8x128xf32>
    %6 = math.absf %5 : vector<2x8x128xf32>
    %7 = math.absf %3 : vector<2x8x128xf32>
    %cst = arith.constant 0.000000e+00 : f32
    %8 = vector.broadcast %cst : f32 to vector<2x8x128xf32>
    %9 = arith.subf %8, %7 : vector<2x8x128xf32>
    %10 = math.exp %9 : vector<2x8x128xf32>
    %cst_6 = arith.constant 1.000000e+00 : f32
    %11 = vector.broadcast %cst_6 : f32 to vector<2x8x128xf32>
    %12 = arith.addf %11, %10 : vector<2x8x128xf32>
    %cst_7 = arith.constant 1.000000e+00 : f32
    %13 = vector.broadcast %cst_7 : f32 to vector<2x8x128xf32>
    %14 = arith.divf %13, %12 : vector<2x8x128xf32>
    %cst_8 = arith.constant 0.000000e+00 : f32
    %15 = vector.broadcast %cst_8 : f32 to vector<2x8x128xf32>
    %16 = arith.cmpf oge, %3, %15 : vector<2x8x128xf32>
    %17 = arith.mulf %10, %14 : vector<2x8x128xf32>
    %18 = arith.select %16, %14, %17 : vector<2x8x128xi1>, vector<2x8x128xf32>
    %c0_9 = arith.constant 0 : index
    %c0_10 = arith.constant 0 : index
    %19 = vector.load %arg5[%c0_9, %c0_10] : memref<2x128xf32, #tpu.memory_space<vmem>>, vector<2x128xf32>
    %20 = arith.mulf %18, %5 : vector<2x8x128xf32>
    %cst_11 = arith.constant dense<0.000000e+00> : vector<2x128xf32>
    %21 = vector.multi_reduction <add>, %20, %cst_11 [1] : vector<2x8x128xf32> to vector<2x128xf32>
    %22 = arith.addf %19, %21 : vector<2x128xf32>
    %c0_12 = arith.constant 0 : index
    %c0_13 = arith.constant 0 : index
    %23 = vector.load %arg5[%c0_12, %c0_13] : memref<2x128xf32, #tpu.memory_space<vmem>>, vector<2x128xf32>
    tpu.vector_store %arg5[%c0_12, %c0_13], %22 {strides = array<i32>} : memref<2x128xf32, #tpu.memory_space<vmem>>, vector<2x128xf32>,
    %c0_14 = arith.constant 0 : index
    %c0_15 = arith.constant 0 : index
    %24 = vector.load %arg6[%c0_14, %c0_15] : memref<2x128xf32, #tpu.memory_space<vmem>>, vector<2x128xf32>
    %25 = arith.addf %18, %6 : vector<2x8x128xf32>
    %cst_16 = arith.constant dense<0.000000e+00> : vector<2x128xf32>
    %26 = vector.multi_reduction <add>, %25, %cst_16 [1] : vector<2x8x128xf32> to vector<2x128xf32>
    %27 = arith.addf %24, %26 : vector<2x128xf32>
    %c0_17 = arith.constant 0 : index
    %c0_18 = arith.constant 0 : index
    %28 = vector.load %arg6[%c0_17, %c0_18] : memref<2x128xf32, #tpu.memory_space<vmem>>, vector<2x128xf32>
    tpu.vector_store %arg6[%c0_17, %c0_18], %27 {strides = array<i32>} : memref<2x128xf32, #tpu.memory_space<vmem>>, vector<2x128xf32>,
    %cst_19 = arith.constant 0.000000e+00 : f32
    %29 = vector.broadcast %cst_19 : f32 to vector<2x8x128xf32>
    %30 = arith.maximumf %3, %29 : vector<2x8x128xf32>
    %cst_20 = arith.constant 1.000000e+00 : f32
    %31 = vector.broadcast %cst_20 : f32 to vector<2x8x128xf32>
    %32 = arith.addf %31, %10 : vector<2x8x128xf32>
    %33 = math.log %32 : vector<2x8x128xf32>
    %34 = arith.addf %30, %33 : vector<2x8x128xf32>
    %35 = arith.mulf %3, %5 : vector<2x8x128xf32>
    %36 = arith.subf %34, %35 : vector<2x8x128xf32>
    %37 = arith.addf %5, %18 : vector<2x8x128xf32>
    %cst_21 = arith.constant 2.000000e+00 : f32
    %38 = vector.broadcast %cst_21 : f32 to vector<2x8x128xf32>
    %39 = arith.mulf %38, %5 : vector<2x8x128xf32>
    %40 = arith.mulf %39, %18 : vector<2x8x128xf32>
    %41 = arith.subf %37, %40 : vector<2x8x128xf32>
    %cst_22 = arith.constant -5.000000e-01 : f32
    %42 = vector.broadcast %cst_22 : f32 to vector<2x8x128xf32>
    %43 = arith.mulf %42, %5 : vector<2x8x128xf32>
    %cst_23 = arith.constant 7.500000e-01 : f32
    %44 = vector.broadcast %cst_23 : f32 to vector<2x8x128xf32>
    %45 = arith.addf %44, %43 : vector<2x8x128xf32>
    %c0_24 = arith.constant 0 : index
    %c0_25 = arith.constant 0 : index
    %46 = vector.load %arg7[%c0_24, %c0_25] : memref<2x128xf32, #tpu.memory_space<vmem>>, vector<2x128xf32>
    %47 = arith.mulf %41, %41 : vector<2x8x128xf32>
    %48 = arith.mulf %45, %47 : vector<2x8x128xf32>
    %49 = arith.mulf %48, %36 : vector<2x8x128xf32>
    %cst_26 = arith.constant dense<0.000000e+00> : vector<2x128xf32>
    %50 = vector.multi_reduction <add>, %49, %cst_26 [1] : vector<2x8x128xf32> to vector<2x128xf32>
    %51 = arith.addf %46, %50 : vector<2x128xf32>
    %c0_27 = arith.constant 0 : index
    %c0_28 = arith.constant 0 : index
    %52 = vector.load %arg7[%c0_27, %c0_28] : memref<2x128xf32, #tpu.memory_space<vmem>>, vector<2x128xf32>
    tpu.vector_store %arg7[%c0_27, %c0_28], %51 {strides = array<i32>} : memref<2x128xf32, #tpu.memory_space<vmem>>, vector<2x128xf32>,
    return
  }
  func.func @transform_0(%arg0: i32, %arg1: i32, %arg2: i32) -> (i32, i32, i32) {
    %c1_i32 = arith.constant 1 : i32
    %0 = arith.muli %arg0, %c1_i32 : i32
    %1 = arith.addi %0, %arg2 : i32
    %c0_i32 = arith.constant 0 : i32
    %c0_i32_0 = arith.constant 0 : i32
    return %arg1, %1, %c0_i32 : i32, i32, i32
  }
  func.func @transform_1(%arg0: i32, %arg1: i32, %arg2: i32) -> (i32, i32, i32) {
    %c1_i32 = arith.constant 1 : i32
    %0 = arith.muli %arg0, %c1_i32 : i32
    %1 = arith.addi %0, %arg2 : i32
    %c0_i32 = arith.constant 0 : i32
    %c0_i32_0 = arith.constant 0 : i32
    return %arg1, %1, %c0_i32 : i32, i32, i32
  }
  func.func @transform_2(%arg0: i32, %arg1: i32, %arg2: i32) -> (i32, i32) {
    %c0_i32 = arith.constant 0 : i32
    return %arg1, %arg0 : i32, i32
  }
  func.func @transform_3(%arg0: i32, %arg1: i32, %arg2: i32) -> (i32, i32) {
    %c0_i32 = arith.constant 0 : i32
    return %arg1, %arg0 : i32, i32
  }
  func.func @transform_4(%arg0: i32, %arg1: i32, %arg2: i32) -> (i32, i32) {
    %c0_i32 = arith.constant 0 : i32
    return %arg1, %arg0 : i32, i32
  }
}

</mosaic_0001>

<bundles_post_ra>
// kernel: tpu_custom_call.1
= control target key start
LH: loop header
LB: loop body
LE: loop exit
PB: predicated region body
PF: predicated region fallthrough
CT: control target
= control target key end

     0   :  { %10 = vsyncpa [#allocation3], 0  ;;  %s473_s0 = inlined_call_operand.hbm [shape: f32[2,8,128], index: 0, kind: input, shape index: {}]   ;;  %s474_s1 = inlined_call_operand.hbm [shape: s8[2,8,128], index: 1, kind: input, shape index: {}]   ;;  %s475_s2 = inlined_call_operand.hbm [shape: f32[2,128], index: 2, kind: output, shape index: {0}]   ;;  %s476_s3 = inlined_call_operand.hbm [shape: f32[2,128], index: 3, kind: output, shape index: {1}]   ;;  %s477_s4 = inlined_call_operand.hbm [shape: f32[2,128], index: 4, kind: output, shape index: {2}]  }
   0x1   :  { %11 = vsyncpa [#allocation6], 0 }
   0x2   :  { %12 = vsyncpa [#allocation4], 0 }
   0x3   :  { %13 = vsyncpa [#allocation9], 0  ;;  %s368_s15 = smov [#allocation2]   ;;  %s250_s19 = scalar_lea.hbm %s473_s0, 256 }
   0x4   :  { %s22_s16 = sshll.u32 %s368_s15, 4  ;;  %p251_p0 = scmp.ne.s32.totalorder %s473_s0, %s250_s19  ;;  %s23_s16 = int_to_ptr.vmem [resolvable:$true] %s22_s16 }
   0x5   :  { %p254_p1 = scmp.lt.u32.totalorder %s250_s19, %s473_s0 }
   0x7   :  { %p256_p2 = pnand %p254_p1, %p251_p0 }
   0x9   :  { %259 = shalt.err (!%p256_p2)
}
   0xa   :  { %s260_s24 = scalar_lea.vmem %s23_s16, 256  ;;  %p265_p4 = scmp.lt.s32.totalorder %s23_s16, %s23_s16 }
   0xb   :  { %p261_p3 = scmp.ne.s32.totalorder %s23_s16, %s260_s24  ;;  %p266_p5 = scmp.lt.s32.totalorder %s260_s24, %s260_s24 }
   0xd   :  { %p267_p6 = por %p266_p5, %p265_p4 }
   0xf   :  { %p268_p7 = pnand %p267_p6, %p261_p3 }
  0x11   :  { %271 = shalt.err (!%p268_p7)
}
  0x12   :  { %s369_s25 = smov 128   ;;  %s370_s26 = smov 8  }
  0x13   :  { %28 = dma.hbm_to_vmem [thread:$0]  %s473_s0, 256, %s23_s16, [#allocation3], %s369_s25, %s369_s25, %s370_s26  }
  0x14   :  { %s371_s29 = smov [#allocation5]   ;;  %s272_s7 = scalar_lea.hbm %s474_s1, 64 }
  0x15   :  { %s37_s30 = sshll.u32 %s371_s29, 4  ;;  %p273_p8 = scmp.ne.s32.totalorder %s474_s1, %s272_s7  ;;  %s38_s30 = int_to_ptr.vmem [resolvable:$true] %s37_s30 }
  0x16   :  { %p276_p9 = scmp.lt.u32.totalorder %s272_s7, %s474_s1 }
  0x18   :  { %p278_p10 = pnand %p276_p9, %p273_p8 }
  0x1a   :  { %281 = shalt.err (!%p278_p10)
}
  0x1b   :  { %s282_s12 = scalar_lea.vmem %s38_s30, 64  ;;  %p287_p12 = scmp.lt.s32.totalorder %s38_s30, %s38_s30 }
  0x1c   :  { %p283_p11 = scmp.ne.s32.totalorder %s38_s30, %s282_s12  ;;  %p288_p13 = scmp.lt.s32.totalorder %s282_s12, %s282_s12 }
  0x1e   :  { %p289_p0 = por %p288_p13, %p287_p12 }
  0x20   :  { %p290_p1 = pnand %p289_p0, %p283_p11 }
  0x22   :  { %293 = shalt.err (!%p290_p1)
}
  0x23   :  { %s372_s0 = smov 32   ;;  %s373_s13 = smov 2  }
  0x24   :  { %43 = dma.hbm_to_vmem [thread:$0]  %s474_s1, 64, %s38_s30, [#allocation6], %s372_s0, %s372_s0, %s373_s13  }
  0x25   :  { %360 = dma.done.wait [#allocation3], 256  }
  0x26   :  { %361 = vsyncadd [#allocation3], 4294967040 }
  0x27   :  { %362 = dma.done.wait [#allocation6], 64  }
  0x28   :  { %363 = vsyncadd [#allocation6], 4294967232  ;;  %v374_v0 = vmov 0.0   ;;  %v59_v1 = vld [vmem:[#allocation2] sm:$0xff]  ;;  %v60_v2 = vld [vmem:[#allocation2 + $0x8] sm:$0xff]  ;;  %vm106_vm2 = vcmask 1041409  }
  0x29   :  { %57 = vst [vmem:[#allocation8] sm:$0x3] %v374_v0  ;;  %56 = vst [vmem:[#allocation7] sm:$0x3] %v374_v0  ;;  %v69_v3 = vand.u32 2147483647, %v59_v1 }
  0x2a   :  { %58 = vst [vmem:[#allocation10] sm:$0x3] %v374_v0  ;;  %v70_v4 = vand.u32 2147483647, %v60_v2  ;;  %v225_v13 = vld [vmem:[#allocation5] sm:$0xf]  }
  0x2b   :  { %v71_v5 = vsub.f32 0.0, %v69_v3  ;;  %v226_v14 = vunpack.c.0.s8 %v225_v13  ;;  %v227_v15 = vunpack.c.1.s8 %v225_v13  ;;  %vm83_vm0 = vcmp.ge.f32.partialorder %v59_v1, 0.0  ;;  %s375_s1 = smov [#allocation8]   ;;  %s376_s17 = smov [#allocation7]  }
  0x2c   :  { %v72_v6 = vsub.f32 0.0, %v70_v4  ;;  %vm84_vm1 = vcmp.ge.f32.partialorder %v60_v2, 0.0  ;;  %v132_v23 = vmax.f32 %v59_v1, 0.0  ;;  %v133_v26 = vmax.f32 %v60_v2, 0.0  ;;  %s197_s16 = sshll.u32 %s375_s1, 4  ;;  %s187_s18 = sshll.u32 %s376_s17, 4  ;;  %s198_s16 = int_to_ptr.vmem [resolvable:$true] %s197_s16  ;;  %s429_s18 = int_to_ptr.vmem [resolvable:$true] %s187_s18 }
  0x2d   :  { %v73_v7 = vmul.f32 1.442695, %v71_v5  ;;  %v65_v16 = vcvt.s32.f32 %v226_v14  ;;  %v66_v17 = vcvt.s32.f32 %v227_v15  ;;  %s294_s19 = scalar_lea.vmem %s198_s16, 32  ;;  %p299_p3 = scmp.lt.s32.totalorder %s198_s16, %s198_s16 }
  0x2e   :  { %v75_v8 = vmul.f32 1.442695, %v72_v6  ;;  %p295_p2 = scmp.ne.s32.totalorder %s198_s16, %s294_s19  ;;  %p300_p4 = scmp.lt.s32.totalorder %s294_s19, %s294_s19 }
  0x2f   :  { %238 = vpow2.f32 %v73_v7  ;;  %v67_v19 = vand.u32 2147483647, %v65_v16  ;;  %v68_v21 = vand.u32 2147483647, %v66_v17  ;;  %v140_v27 = vmul.f32 %v65_v16, %v59_v1 }
  0x30   :  { %240 = vpow2.f32 %v75_v8  ;;  %v141_v28 = vmul.f32 %v66_v17, %v60_v2  ;;  %v146_v32 = vmul.f32 2.0, %v65_v16  ;;  %v147_v33 = vmul.f32 2.0, %v66_v17  ;;  %p301_p5 = por %p300_p4, %p299_p3 }
  0x31   :  { %v152_v41 = vmul.f32 -0.5, %v65_v16  ;;  %v153_v45 = vmul.f32 -0.5, %v66_v17 }
  0x32   :  { %p302_p6 = pnand %p301_p5, %p295_p2 }
  0x33   :  { %v154_v57 = vadd.f32 0.75, %v152_v41  ;;  %v155_v61 = vadd.f32 0.75, %v153_v45 }
  0x39   :  { %v239_v9 = vpop.eup %238 }
  0x3a   :  { %v241_v10 = vpop.eup %240  ;;  %v77_v11 = vadd.f32 1.0, %v239_v9 }
  0x3b   :  { %v78_v12 = vadd.f32 1.0, %v241_v10 }
  0x3c   :  { %242 = vrcp.f32 %v77_v11 }
  0x3d   :  { %244 = vrcp.f32 %v78_v12 }
  0x3e   :  { %246 = vlog2.f32 %v77_v11 }
  0x3f   :  { %248 = vlog2.f32 %v78_v12 }
  0x46   :  { %v243_v18 = vpop.eup %242 }
  0x47   :  { %v245_v20 = vpop.eup %244  ;;  %v85_v22 = vmul.f32 %v243_v18, %v239_v9 }
  0x48   :  { %v247_v24 = vpop.eup %246  ;;  %v86_v25 = vmul.f32 %v245_v20, %v241_v10 }
  0x49   :  { %v249_v29 = vpop.eup %248  ;;  %v87_v30 = vsel %vm83_vm0, %v243_v18, %v85_v22  ;;  %v135_v31 = vmul.f32 0.6931472, %v247_v24  ;;  %v111_v18 = vld [vmem:[#allocation8] sm:$0x3] }
  0x4a   :  { %v88_v34 = vsel %vm84_vm1, %v245_v20, %v86_v25  ;;  %v112_v35 = vadd.f32 %v87_v30, %v67_v19  ;;  %v90_v36 = vmul.f32 %v87_v30, %v65_v16  ;;  %v137_v37 = vmul.f32 0.6931472, %v249_v29  ;;  %v89_v20 = vld [vmem:[#allocation7] sm:$0x3] }
  0x4b   :  { %v113_v38 = vadd.f32 %v88_v34, %v68_v21  ;;  %v91_v39 = vmul.f32 %v88_v34, %v66_v17  ;;  %v144_v40 = vadd.f32 %v87_v30, %v65_v16  ;;  %v145_v44 = vadd.f32 %v88_v34, %v66_v17 }
  0x4c   :  { %v114_v42 = vrot.slane %v112_v35, 4  ;;  %v92_v43 = vrot.slane %v90_v36, 4  ;;  %v138_v48 = vadd.f32 %v135_v31, %v132_v23  ;;  %v148_v49 = vmul.f32 %v146_v32, %v87_v30 }
  0x4d   :  { %v120_v46 = vrot.slane %v113_v38, 4  ;;  %v98_v47 = vrot.slane %v91_v39, 4  ;;  %v139_v52 = vadd.f32 %v137_v37, %v133_v26  ;;  %v149_v53 = vmul.f32 %v147_v33, %v88_v34 }
  0x4e   :  { %v115_v50 = vadd.f32 %v114_v42, %v112_v35  ;;  %v93_v51 = vadd.f32 %v92_v43, %v90_v36  ;;  %v150_v56 = vsub.f32 %v144_v40, %v148_v49  ;;  %v142_v0 = vsub.f32 %v138_v48, %v140_v27 }
  0x4f   :  { %v121_v54 = vadd.f32 %v120_v46, %v113_v38  ;;  %v99_v55 = vadd.f32 %v98_v47, %v91_v39  ;;  %v151_v60 = vsub.f32 %v145_v44, %v149_v53  ;;  %v143_v4 = vsub.f32 %v139_v52, %v141_v28 }
  0x50   :  { %v116_v58 = vrot.slane %v115_v50, 2  ;;  %v94_v59 = vrot.slane %v93_v51, 2  ;;  %v157_v1 = vmul.f32 %v150_v56, %v150_v56 }
  0x51   :  { %v122_v62 = vrot.slane %v121_v54, 2  ;;  %v100_v63 = vrot.slane %v99_v55, 2  ;;  %v158_v5 = vmul.f32 %v151_v60, %v151_v60 }
  0x52   :  { %v117_v2 = vadd.f32 %v116_v58, %v115_v50  ;;  %v95_v3 = vadd.f32 %v94_v59, %v93_v51  ;;  %v159_v8 = vmul.f32 %v157_v1, %v154_v57 }
  0x53   :  { %v123_v6 = vadd.f32 %v122_v62, %v121_v54  ;;  %v101_v7 = vadd.f32 %v100_v63, %v99_v55  ;;  %v160_v11 = vmul.f32 %v158_v5, %v155_v61 }
  0x54   :  { %v118_v9 = vrot.slane %v117_v2, 1  ;;  %v96_v10 = vrot.slane %v95_v3, 1  ;;  %v161_v14 = vmul.f32 %v159_v8, %v142_v0 }
  0x55   :  { %v124_v12 = vrot.slane %v123_v6, 1  ;;  %v102_v13 = vrot.slane %v101_v7, 1  ;;  %v162_v17 = vmul.f32 %v160_v11, %v143_v4 }
  0x56   :  { %v119_v15 = vadd.f32 %v118_v9, %v117_v2  ;;  %v97_v16 = vadd.f32 %v96_v10, %v95_v3  ;;  %v163_v22 = vrot.slane %v161_v14, 4 }
  0x57   :  { %v125_v19 = vadd.f32 %v124_v12, %v123_v6  ;;  %v103_v21 = vadd.f32 %v102_v13, %v101_v7  ;;  %v169_v23 = vrot.slane %v162_v17, 4 }
  0x58   :  { %v164_v26 = vadd.f32 %v163_v22, %v161_v14 }
  0x59   :  { %v128_v24 = vsel %vm106_vm2, %v125_v19, %v119_v15  ;;  %v107_v25 = vsel %vm106_vm2, %v103_v21, %v97_v16  ;;  %v170_v29 = vadd.f32 %v169_v23, %v162_v17 }
  0x5a   :  { %v130_v27 = vadd.f32 %v128_v24, %v111_v18  ;;  %v109_v28 = vadd.f32 %v107_v25, %v89_v20  ;;  %v165_v30 = vrot.slane %v164_v26, 2 }
  0x5b   :  { %v171_v31 = vrot.slane %v170_v29, 2 }
  0x5c   :  { %131 = vst [vmem:[#allocation8] sm:$0x3] %v130_v27  ;;  %110 = vst [vmem:[#allocation7] sm:$0x3] %v109_v28  ;;  %v166_v32 = vadd.f32 %v165_v30, %v164_v26 }
  0x5d   :  { %305 = shalt.err (!%p302_p6)
}
  0x5e   :  { %s306_s22 = scalar_lea.hbm %s476_s3, 32 }
  0x5f   :  { %p307_p7 = scmp.ne.s32.totalorder %s476_s3, %s306_s22  ;;  %p310_p8 = scmp.lt.u32.totalorder %s306_s22, %s476_s3 }
  0x61   :  { %p312_p9 = pnand %p310_p8, %p307_p7 }
  0x63   :  { %315 = shalt.err (!%p312_p9)
}
  0x64   :  { %200 = dma.vmem_to_hbm [thread:$0]  %s198_s16, 32, %s476_s3, [#allocation9]   ;;  %v172_v33 = vadd.f32 %v171_v31, %v170_v29 }
  0x65   :  { %s316_s29 = scalar_lea.vmem %s429_s18, 32  ;;  %p321_p11 = scmp.lt.s32.totalorder %s429_s18, %s429_s18 }
  0x66   :  { %p317_p10 = scmp.ne.s32.totalorder %s429_s18, %s316_s29  ;;  %p322_p12 = scmp.lt.s32.totalorder %s316_s29, %s316_s29 }
  0x68   :  { %p323_p13 = por %p322_p12, %p321_p11 }
  0x6a   :  { %p324_p0 = pnand %p323_p13, %p317_p10 }
  0x6c   :  { %327 = shalt.err (!%p324_p0)
}
  0x6d   :  { %s328_s6 = scalar_lea.hbm %s475_s2, 32 }
  0x6e   :  { %p329_p1 = scmp.ne.s32.totalorder %s475_s2, %s328_s6  ;;  %p332_p2 = scmp.lt.u32.totalorder %s328_s6, %s475_s2 }
  0x70   :  { %p334_p3 = pnand %p332_p2, %p329_p1 }
  0x72   :  { %337 = shalt.err (!%p334_p3)
}
  0x73   :  { %190 = dma.vmem_to_hbm [thread:$0]  %s429_s18, 32, %s475_s2, [#allocation4]   ;;  %v167_v34 = vrot.slane %v166_v32, 1  ;;  %v173_v35 = vrot.slane %v172_v33, 1  ;;  %v156_v37 = vld [vmem:[#allocation10] sm:$0x3] }
  0x74   :  { %s377_s12 = smov [#allocation10]  }
  0x75   :  { %v168_v36 = vadd.f32 %v167_v34, %v166_v32  ;;  %v174_v38 = vadd.f32 %v173_v35, %v172_v33  ;;  %s207_s0 = sshll.u32 %s377_s12, 4  ;;  %s208_s0 = int_to_ptr.vmem [resolvable:$true] %s207_s0 }
  0x76   :  { %s338_s13 = scalar_lea.vmem %s208_s0, 32  ;;  %p343_p5 = scmp.lt.s32.totalorder %s208_s0, %s208_s0 }
  0x77   :  { %v177_v39 = vsel %vm106_vm2, %v174_v38, %v168_v36  ;;  %p339_p4 = scmp.ne.s32.totalorder %s208_s0, %s338_s13  ;;  %p344_p6 = scmp.lt.s32.totalorder %s338_s13, %s338_s13 }
  0x78   :  { %v179_v40 = vadd.f32 %v177_v39, %v156_v37 }
  0x79   :  { %p345_p7 = por %p344_p6, %p343_p5 }
  0x7a   :  { %180 = vst [vmem:[#allocation10] sm:$0x3] %v179_v40 }
  0x7b   :  { %p346_p8 = pnand %p345_p7, %p339_p4 }
  0x7d   :  { %349 = shalt.err (!%p346_p8)
}
  0x7e   :  { %s350_s15 = scalar_lea.hbm %s477_s4, 32 }
  0x7f   :  { %p351_p9 = scmp.ne.s32.totalorder %s477_s4, %s350_s15  ;;  %p354_p10 = scmp.lt.u32.totalorder %s350_s15, %s477_s4 }
  0x81   :  { %p356_p11 = pnand %p354_p10, %p351_p9 }
  0x83   :  { %359 = shalt.err (!%p356_p11)
}
  0x84   :  { %210 = dma.vmem_to_hbm [thread:$0]  %s208_s0, 32, %s477_s4, [#allocation9]  }
  0x85   :  { %364 = dma.done.wait [#allocation4], 32  }
  0x86   :  { %365 = vsyncadd [#allocation4], 4294967264 }
  0x87   :  { %366 = dma.done.wait [#allocation9], 64  }
  0x88   :  { %367 = vsyncadd [#allocation9], 4294967232 }
  0x89   :  { %220 = vsyncpa [#allocation3], 1 }
  0x8a   :  { %221 = vsyncpa [#allocation6], 1 }
  0x8b   :  { %222 = vsyncpa [#allocation4], 1 }
  0x8c   :  { %223 = vsyncpa [#allocation9], 1 }

</bundles_post_ra>
